<compile_context>
chip_gen: v7x
topology: tpu7x:2x2x1
jax: 0.10.0
libtpu: 0.0.40
codegen_flags: <defaults>
</compile_context>

<pallas_src>
import functools

import jax
import jax.numpy as jnp
from jax import lax
from jax.experimental import pallas as pl
from jax.experimental.pallas import tpu as pltpu


def _round_up(x, m):
    return ((x + m - 1) // m) * m


# -----------------------------------------------------------------------------
# Fused multi-step decoder kernel.  grid = (T,): one grid step per token.
# -----------------------------------------------------------------------------
def _decoder_seq_kernel(num_layers, hidden_size, *refs):
    """refs = (ids, emb, state_in,
               [w_ih_t, w_hh_t, bias] * L, fc_w, fc_b,
               pred_out, state_out)."""
    ids_ref, emb_ref, state_in_ref = refs[:3]
    rest = refs[3:]
    layer_refs = rest[:3 * num_layers]
    fc_w_ref = rest[3 * num_layers]
    fc_b_ref = rest[3 * num_layers + 1]
    pred_ref, state_ref = rest[3 * num_layers + 2:]

    H = hidden_size
    Bp = state_ref.shape[0]
    Vp = emb_ref.shape[0]

    t = pl.program_id(0)

    # State layout (lane-dense, a single (8,128) vreg at these sizes):
    #   state[:, 2l*H:(2l+1)*H] = h_l,   state[:, (2l+1)*H:(2l+2)*H] = c_l
    @pl.when(t == 0)
    def _():
        state_ref[...] = state_in_ref[...]

    state = state_ref[...]                                        # (Bp, 2*L*H)

    # ---- embedding lookup fused as one-hot @ table (fine at Vp=128) ---------
    lane = lax.broadcasted_iota(jnp.int32, (Bp, Vp), 1)
    onehot = (lane == ids_ref[0]).astype(jnp.float32)             # (Bp, Vp)
    x = jnp.dot(onehot, emb_ref[...],
                preferred_element_type=jnp.float32)               # (Bp, E)
    # nn.Dropout(embedding) is identity in eval mode.

    # ---- unrolled multi-layer LSTM step --------------------------------------
    new_state = []
    for l in range(num_layers):
        w_ih_ref = layer_refs[3 * l]        # (In, 4H)
        w_hh_ref = layer_refs[3 * l + 1]    # (H, 4H)
        b_ref = layer_refs[3 * l + 2]       # (1, 4H)
        h = state[:, (2 * l) * H:(2 * l + 1) * H]
        c = state[:, (2 * l + 1) * H:(2 * l + 2) * H]

        # two dots instead of a lane-concat of [x, h] -> no relayout work
        gates = (jnp.dot(x, w_ih_ref[...], preferred_element_type=jnp.float32)
                 + jnp.dot(h, w_hh_ref[...], preferred_element_type=jnp.float32)
                 + b_ref[...])                                    # (Bp, 4H)

        # two full-width transcendental passes, gate blocks sliced from them
        sig = jax.nn.sigmoid(gates)
        tnh = jnp.tanh(gates)
        i_g = sig[:, 0 * H:1 * H]
        f_g = sig[:, 1 * H:2 * H]
        g_g = tnh[:, 2 * H:3 * H]
        o_g = sig[:, 3 * H:4 * H]

        c_new = f_g * c + i_g * g_g
        h_new = o_g * jnp.tanh(c_new)
        new_state += [h_new, c_new]
        x = h_new                           # inter-layer dropout identity (eval)

    # one lane-dense, full-vreg state store per step (no masked partial stores)
    state_ref[...] = jnp.concatenate(new_state, axis=-1)

    # ---- fused output projection (lane-dense padded O) ------------------------
    pred_ref[0] = (jnp.dot(x, fc_w_ref[...], preferred_element_type=jnp.float32)
                   + fc_b_ref[...])


# -----------------------------------------------------------------------------
# Parameters (PyTorch-equivalent, pre-laid-out for the kernel)
# -----------------------------------------------------------------------------
def init_decoder_params(key, input_size, embedding_size, hidden_size,
                        output_size, num_layers):
    params = {}

    k_emb, key = jax.random.split(key)
    emb = jax.random.normal(k_emb, (input_size, embedding_size), jnp.float32)
    v_pad = _round_up(input_size, 128)
    params["embedding_padded"] = jnp.pad(emb, ((0, v_pad - input_size), (0, 0)))

    bound = 1.0 / float(hidden_size) ** 0.5
    layers = []
    for layer in range(num_layers):
        in_dim = embedding_size if layer == 0 else hidden_size
        k1, k2, k3, k4, key = jax.random.split(key, 5)
        w_ih = jax.random.uniform(k1, (4 * hidden_size, in_dim),
                                  jnp.float32, -bound, bound)
        w_hh = jax.random.uniform(k2, (4 * hidden_size, hidden_size),
                                  jnp.float32, -bound, bound)
        b_ih = jax.random.uniform(k3, (4 * hidden_size,),
                                  jnp.float32, -bound, bound)
        b_hh = jax.random.uniform(k4, (4 * hidden_size,),
                                  jnp.float32, -bound, bound)
        layers.append({
            "w_ih_t": w_ih.T,                               # (In, 4H)
            "w_hh_t": w_hh.T,                               # (H, 4H)
            "bias": (b_ih + b_hh).reshape(1, -1),           # (1, 4H)
        })
    params["lstm"] = layers

    k_fw, k_fb, key = jax.random.split(key, 3)
    fc_w = jax.random.uniform(k_fw, (output_size, hidden_size),
                              jnp.float32, -bound, bound)
    fc_b = jax.random.uniform(k_fb, (output_size,),
                              jnp.float32, -bound, bound)
    o_pad = _round_up(output_size, 128)
    params["fc_w_t_padded"] = jnp.pad(fc_w.T,
                                      ((0, 0), (0, o_pad - output_size)))  # (H,Op)
    params["fc_b_padded"] = jnp.pad(fc_b.reshape(1, -1),
                                    ((0, 0), (0, o_pad - output_size)))    # (1,Op)
    return params


# -----------------------------------------------------------------------------
# Forward: whole T-step decode in ONE pallas_call (weights VMEM-resident)
# -----------------------------------------------------------------------------
@functools.partial(jax.jit, static_argnames=("output_size",))
def decoder_forward_seq(params, ids, hidden, cell, *, output_size):
    """
    ids:    (T, B)  int32 token ids (teacher-forced)
    hidden: (L, B, H) float32, cell: (L, B, H) float32
    returns (preds (T, B, output_size), hidden, cell)
    """
    T, B = ids.shape
    L, _, H = hidden.shape
    Bp = _round_up(max(B, 8), 8)
    pad_b = Bp - B

    emb = params["embedding_padded"]       # (Vp, E)
    fc_w = params["fc_w_t_padded"]         # (H, Op)
    fc_b = params["fc_b_padded"]           # (1, Op)
    Op = fc_w.shape[1]

    # pad/pack ONCE per sequence (amortized over T in-kernel steps)
    ids_p = jnp.pad(ids.astype(jnp.int32), ((0, 0), (0, pad_b)))[..., None]  # (T,Bp,1)
    h_p = jnp.pad(hidden.astype(jnp.float32), ((0, 0), (0, pad_b), (0, 0)))
    c_p = jnp.pad(cell.astype(jnp.float32), ((0, 0), (0, pad_b), (0, 0)))
    # lane-dense packed state: (Bp, L*2*H) with lanes = [h0 | c0 | h1 | c1 ...]
    state0 = (jnp.stack([h_p, c_p], axis=1)          # (L, 2, Bp, H)
              .transpose(2, 0, 1, 3)
              .reshape(Bp, L * 2 * H))

    const2 = lambda t: (0, 0)              # weights: resident across all steps
    layer_args, layer_specs = [], []
    for lp in params["lstm"]:
        layer_args += [lp["w_ih_t"], lp["w_hh_t"], lp["bias"]]
        layer_specs += [pl.BlockSpec(lp["w_ih_t"].shape, const2),
                        pl.BlockSpec(lp["w_hh_t"].shape, const2),
                        pl.BlockSpec(lp["bias"].shape, const2)]

    kernel = functools.partial(_decoder_seq_kernel, L, H)

    pred_p, state_out = pl.pallas_call(
        kernel,
        grid=(T,),
        out_shape=(jax.ShapeDtypeStruct((T, Bp, Op), jnp.float32),
                   jax.ShapeDtypeStruct((Bp, L * 2 * H), jnp.float32)),
        in_specs=[pl.BlockSpec((1, Bp, 1), lambda t: (t, 0, 0)),   # ids, per step
                  pl.BlockSpec(emb.shape, const2),                 # embedding
                  pl.BlockSpec(state0.shape, const2)]              # init state
                 + layer_specs
                 + [pl.BlockSpec(fc_w.shape, const2),
                    pl.BlockSpec(fc_b.shape, const2)],
        out_specs=(pl.BlockSpec((1, Bp, Op), lambda t: (t, 0, 0)),
                   pl.BlockSpec(state0.shape, const2)),            # VMEM-resident
        input_output_aliases={2: 1},       # packed state updated in place
        compiler_params=pltpu.CompilerParams(
            dimension_semantics=("arbitrary",)),
    )(ids_p, emb, state0, *layer_args, fc_w, fc_b)

    # unpack ONCE after the whole sequence; padded rows dropped here
    s = state_out.reshape(Bp, L, 2, H).transpose(1, 2, 0, 3)       # (L, 2, Bp, H)
    return (pred_p[:, :B, :output_size], s[:, 0, :B, :], s[:, 1, :B, :])


@functools.partial(jax.jit, static_argnames=("output_size",))
def decoder_forward(params, x, hidden, cell, *, output_size):
    """Single decode step == the original PyTorch Decoder.forward(x, h, c)."""
    preds, h, c = decoder_forward_seq(params, x[None, :], hidden, cell,
                                      output_size=output_size)
    return preds[0], h, c


# -----------------------------------------------------------------------------
# Pure-JAX reference (same math) for correctness checks
# -----------------------------------------------------------------------------
def _reference_step(params, x_ids, hidden, cell, output_size):
    H = hidden.shape[-1]
    layer_in = jnp.take(params["embedding_padded"], x_ids, axis=0)
    new_h, new_c = [], []
    for l, lp in enumerate(params["lstm"]):
        h, c = hidden[l], cell[l]
        gates = layer_in @ lp["w_ih_t"] + h @ lp["w_hh_t"] + lp["bias"]
        i_g = jax.nn.sigmoid(gates[:, 0 * H:1 * H])
        f_g = jax.nn.sigmoid(gates[:, 1 * H:2 * H])
        g_g = jnp.tanh(gates[:, 2 * H:3 * H])
        o_g = jax.nn.sigmoid(gates[:, 3 * H:4 * H])
        c2 = f_g * c + i_g * g_g
        h2 = o_g * jnp.tanh(c2)
        new_h.append(h2)
        new_c.append(c2)
        layer_in = h2
    pred = layer_in @ params["fc_w_t_padded"] + params["fc_b_padded"]
    return pred[:, :output_size], jnp.stack(new_h, 0), jnp.stack(new_c, 0)


def _reference_seq(params, ids, hidden, cell, output_size):
    preds, h, c = [], hidden, cell
    for t in range(ids.shape[0]):
        p, h, c = _reference_step(params, ids[t], h, c, output_size)
        preds.append(p)
    return jnp.stack(preds, 0), h, c


# -----------------------------------------------------------------------------
if __name__ == "__main__":
    INPUT_SIZE = 50       # vocab
    EMBEDDING_SIZE = 32
    HIDDEN_SIZE = 32
    OUTPUT_SIZE = 50
    NUM_LAYERS = 2
    BATCH = 4
    SEQ_LEN = 8

    key = jax.random.PRNGKey(0)
    k_params, k_x, k_h, k_c = jax.random.split(key, 4)

    params = init_decoder_params(k_params, INPUT_SIZE, EMBEDDING_SIZE,
                                 HIDDEN_SIZE, OUTPUT_SIZE, NUM_LAYERS)

    hidden = jax.random.normal(k_h, (NUM_LAYERS, BATCH, HIDDEN_SIZE), jnp.float32)
    cell = jax.random.normal(k_c, (NUM_LAYERS, BATCH, HIDDEN_SIZE), jnp.float32)

    # --- single-step path: exact module forward semantics --------------------
    x = jax.random.randint(k_x, (BATCH,), 0, INPUT_SIZE, dtype=jnp.int32)
    preds, h_out, c_out = decoder_forward(params, x, hidden, cell,
                                          output_size=OUTPUT_SIZE)
    jax.block_until_ready((preds, h_out, c_out))
    assert preds.shape == (BATCH, OUTPUT_SIZE)
    assert h_out.shape == (NUM_LAYERS, BATCH, HIDDEN_SIZE)
    assert c_out.shape == (NUM_LAYERS, BATCH, HIDDEN_SIZE)

    ref_p, ref_h, ref_c = _reference_step(params, x, hidden, cell, OUTPUT_SIZE)
    assert bool(jnp.all(jnp.isfinite(preds)))
    assert bool(jnp.allclose(preds, ref_p, atol=5e-2, rtol=5e-2))
    assert bool(jnp.allclose(h_out, ref_h, atol=5e-2, rtol=5e-2))
    assert bool(jnp.allclose(c_out, ref_c, atol=5e-2, rtol=5e-2))

    # --- fused multi-step path: T-step decode loop inside ONE pallas_call ----
    ids_seq = jax.random.randint(k_x, (SEQ_LEN, BATCH), 0, INPUT_SIZE,
                                 dtype=jnp.int32)
    preds_s, h_s, c_s = decoder_forward_seq(params, ids_seq, hidden, cell,
                                            output_size=OUTPUT_SIZE)
    jax.block_until_ready((preds_s, h_s, c_s))
    assert preds_s.shape == (SEQ_LEN, BATCH, OUTPUT_SIZE)
    assert h_s.shape == (NUM_LAYERS, BATCH, HIDDEN_SIZE)
    assert c_s.shape == (NUM_LAYERS, BATCH, HIDDEN_SIZE)

    ref_ps, ref_hs, ref_cs = _reference_seq(params, ids_seq, hidden, cell,
                                            OUTPUT_SIZE)
    assert bool(jnp.allclose(preds_s, ref_ps, atol=5e-2, rtol=5e-2))
    assert bool(jnp.allclose(h_s, ref_hs, atol=5e-2, rtol=5e-2))
    assert bool(jnp.allclose(c_s, ref_cs, atol=5e-2, rtol=5e-2))

    print("KERNEL_OK")
</pallas_src>

<mosaic_0001>
module attributes {stable_mosaic.version = 11 : i64} {
  func.func @_decoder_seq_kernel(%arg0: i32, %arg1: memref<1x8x1xi32, #tpu.memory_space<vmem>>, %arg2: memref<128x32xf32, #tpu.memory_space<vmem>>, %arg3: memref<8x128xf32, #tpu.memory_space<vmem>>, %arg4: memref<32x128xf32, #tpu.memory_space<vmem>>, %arg5: memref<32x128xf32, #tpu.memory_space<vmem>>, %arg6: memref<1x128xf32, #tpu.memory_space<vmem>>, %arg7: memref<32x128xf32, #tpu.memory_space<vmem>>, %arg8: memref<32x128xf32, #tpu.memory_space<vmem>>, %arg9: memref<1x128xf32, #tpu.memory_space<vmem>>, %arg10: memref<32x128xf32, #tpu.memory_space<vmem>>, %arg11: memref<1x128xf32, #tpu.memory_space<vmem>>, %arg12: memref<1x8x128xf32, #tpu.memory_space<vmem>>, %arg13: memref<8x128xf32, #tpu.memory_space<vmem>>) attributes {dimension_semantics = [#tpu.dimension_semantics<arbitrary>], iteration_bounds = array<i64: 1>, scalar_prefetch = 0 : i64, scratch_operands = 0 : i64, tpu.core_type = #tpu.core_type<tc>, window_params = [{transform_indices = @transform_0, window_bounds = array<i64: 1, 8, 1>}, {pipeline_mode = #tpu.pipeline_mode<synchronous>, transform_indices = @transform_1, window_bounds = array<i64: 128, 32>}, {pipeline_mode = #tpu.pipeline_mode<synchronous>, transform_indices = @transform_2, window_bounds = array<i64: 8, 128>}, {pipeline_mode = #tpu.pipeline_mode<synchronous>, transform_indices = @transform_3, window_bounds = array<i64: 32, 128>}, {pipeline_mode = #tpu.pipeline_mode<synchronous>, transform_indices = @transform_4, window_bounds = array<i64: 32, 128>}, {pipeline_mode = #tpu.pipeline_mode<synchronous>, transform_indices = @transform_5, window_bounds = array<i64: 1, 128>}, {pipeline_mode = #tpu.pipeline_mode<synchronous>, transform_indices = @transform_6, window_bounds = array<i64: 32, 128>}, {pipeline_mode = #tpu.pipeline_mode<synchronous>, transform_indices = @transform_7, window_bounds = array<i64: 32, 128>}, {pipeline_mode = #tpu.pipeline_mode<synchronous>, transform_indices = @transform_8, window_bounds = array<i64: 1, 128>}, {pipeline_mode = #tpu.pipeline_mode<synchronous>, transform_indices = @transform_9, window_bounds = array<i64: 32, 128>}, {pipeline_mode = #tpu.pipeline_mode<synchronous>, transform_indices = @transform_10, window_bounds = array<i64: 1, 128>}, {transform_indices = @transform_11, window_bounds = array<i64: 1, 8, 128>}, {pipeline_mode = #tpu.pipeline_mode<synchronous>, transform_indices = @transform_12, window_bounds = array<i64: 8, 128>}]} {
    %c0_i32 = arith.constant 0 : i32
    %0 = arith.cmpi eq, %arg0, %c0_i32 : i32
    %1 = arith.extui %0 : i1 to i32
    %c0_i32_0 = arith.constant 0 : i32
    %2 = arith.cmpi ne, %1, %c0_i32_0 : i32
    scf.if %2 {
      %c0_35 = arith.constant 0 : index
      %c0_36 = arith.constant 0 : index
      %73 = vector.load %arg3[%c0_35, %c0_36] : memref<8x128xf32, #tpu.memory_space<vmem>>, vector<8x128xf32>
      %c0_37 = arith.constant 0 : index
      %c0_38 = arith.constant 0 : index
      %74 = vector.load %arg13[%c0_37, %c0_38] : memref<8x128xf32, #tpu.memory_space<vmem>>, vector<8x128xf32>
      tpu.vector_store %arg13[%c0_37, %c0_38], %73 {strides = array<i32>} : memref<8x128xf32, #tpu.memory_space<vmem>>, vector<8x128xf32>,
    } else {
    }
    %c0 = arith.constant 0 : index
    %c0_1 = arith.constant 0 : index
    %3 = vector.load %arg13[%c0, %c0_1] : memref<8x128xf32, #tpu.memory_space<vmem>>, vector<8x128xf32>
    %4 = tpu.iota {dimensions = array<i32: 1>} : vector<8x128xi32>
    %c0_2 = arith.constant 0 : index
    %c0_3 = arith.constant 0 : index
    %c0_4 = arith.constant 0 : index
    %5 = vector.load %arg1[%c0_2, %c0_3, %c0_4] : memref<1x8x1xi32, #tpu.memory_space<vmem>>, vector<1x8x1xi32>
    %6 = vector.shape_cast %5 : vector<1x8x1xi32> to vector<8x1xi32>
    %7 = vector.broadcast %6 : vector<8x1xi32> to vector<8x128xi32>
    %8 = arith.cmpi eq, %4, %7 : vector<8x128xi32>
    %9 = arith.extui %8 : vector<8x128xi1> to vector<8x128xi32>
    %10 = arith.sitofp %9 : vector<8x128xi32> to vector<8x128xf32>
    %c0_5 = arith.constant 0 : index
    %c0_6 = arith.constant 0 : index
    %11 = vector.load %arg2[%c0_5, %c0_6] : memref<128x32xf32, #tpu.memory_space<vmem>>, vector<128x32xf32>
    %cst = arith.constant dense<0.000000e+00> : vector<8x32xf32>
    %12 = tpu.matmul %10, %11, %cst {dimension_numbers = #tpu.dot_dimension_numbers<[1], [0], [0], [1], [0, 0, 1, 1], [], []>} : vector<8x128xf32>, vector<128x32xf32>, vector<8x32xf32> -> vector<8x32xf32>
    %13 = vector.extract_strided_slice %3 {offsets = [0, 0], sizes = [8, 32], strides = [1, 1]} : vector<8x128xf32> to vector<8x32xf32>
    %14 = vector.extract_strided_slice %3 {offsets = [0, 32], sizes = [8, 32], strides = [1, 1]} : vector<8x128xf32> to vector<8x32xf32>
    %c0_7 = arith.constant 0 : index
    %c0_8 = arith.constant 0 : index
    %15 = vector.load %arg4[%c0_7, %c0_8] : memref<32x128xf32, #tpu.memory_space<vmem>>, vector<32x128xf32>
    %cst_9 = arith.constant dense<0.000000e+00> : vector<8x128xf32>
    %16 = tpu.matmul %12, %15, %cst_9 {dimension_numbers = #tpu.dot_dimension_numbers<[1], [0], [0], [1], [0, 0, 1, 1], [], []>} : vector<8x32xf32>, vector<32x128xf32>, vector<8x128xf32> -> vector<8x128xf32>
    %c0_10 = arith.constant 0 : index
    %c0_11 = arith.constant 0 : index
    %17 = vector.load %arg5[%c0_10, %c0_11] : memref<32x128xf32, #tpu.memory_space<vmem>>, vector<32x128xf32>
    %cst_12 = arith.constant dense<0.000000e+00> : vector<8x128xf32>
    %18 = tpu.matmul %13, %17, %cst_12 {dimension_numbers = #tpu.dot_dimension_numbers<[1], [0], [0], [1], [0, 0, 1, 1], [], []>} : vector<8x32xf32>, vector<32x128xf32>, vector<8x128xf32> -> vector<8x128xf32>
    %19 = arith.addf %16, %18 : vector<8x128xf32>
    %c0_13 = arith.constant 0 : index
    %c0_14 = arith.constant 0 : index
    %20 = vector.load %arg6[%c0_13, %c0_14] : memref<1x128xf32, #tpu.memory_space<vmem>>, vector<1x128xf32>
    %21 = vector.broadcast %20 : vector<1x128xf32> to vector<8x128xf32>
    %22 = arith.addf %19, %21 : vector<8x128xf32>
    %23 = arith.negf %22 : vector<8x128xf32>
    %24 = math.exp %23 : vector<8x128xf32>
    %cst_15 = arith.constant 1.000000e+00 : f32
    %25 = vector.broadcast %cst_15 : f32 to vector<8x128xf32>
    %26 = arith.addf %25, %24 : vector<8x128xf32>
    %27 = arith.divf %25, %26 : vector<8x128xf32>
    %28 = math.tanh %22 : vector<8x128xf32>
    %29 = vector.extract_strided_slice %27 {offsets = [0, 0], sizes = [8, 32], strides = [1, 1]} : vector<8x128xf32> to vector<8x32xf32>
    %30 = vector.extract_strided_slice %27 {offsets = [0, 32], sizes = [8, 32], strides = [1, 1]} : vector<8x128xf32> to vector<8x32xf32>
    %31 = vector.extract_strided_slice %28 {offsets = [0, 64], sizes = [8, 32], strides = [1, 1]} : vector<8x128xf32> to vector<8x32xf32>
    %32 = vector.extract_strided_slice %27 {offsets = [0, 96], sizes = [8, 32], strides = [1, 1]} : vector<8x128xf32> to vector<8x32xf32>
    %33 = arith.mulf %30, %14 : vector<8x32xf32>
    %34 = arith.mulf %29, %31 : vector<8x32xf32>
    %35 = arith.addf %33, %34 : vector<8x32xf32>
    %36 = math.tanh %35 : vector<8x32xf32>
    %37 = arith.mulf %32, %36 : vector<8x32xf32>
    %38 = vector.extract_strided_slice %3 {offsets = [0, 64], sizes = [8, 32], strides = [1, 1]} : vector<8x128xf32> to vector<8x32xf32>
    %39 = vector.extract_strided_slice %3 {offsets = [0, 96], sizes = [8, 32], strides = [1, 1]} : vector<8x128xf32> to vector<8x32xf32>
    %c0_16 = arith.constant 0 : index
    %c0_17 = arith.constant 0 : index
    %40 = vector.load %arg7[%c0_16, %c0_17] : memref<32x128xf32, #tpu.memory_space<vmem>>, vector<32x128xf32>
    %cst_18 = arith.constant dense<0.000000e+00> : vector<8x128xf32>
    %41 = tpu.matmul %37, %40, %cst_18 {dimension_numbers = #tpu.dot_dimension_numbers<[1], [0], [0], [1], [0, 0, 1, 1], [], []>} : vector<8x32xf32>, vector<32x128xf32>, vector<8x128xf32> -> vector<8x128xf32>
    %c0_19 = arith.constant 0 : index
    %c0_20 = arith.constant 0 : index
    %42 = vector.load %arg8[%c0_19, %c0_20] : memref<32x128xf32, #tpu.memory_space<vmem>>, vector<32x128xf32>
    %cst_21 = arith.constant dense<0.000000e+00> : vector<8x128xf32>
    %43 = tpu.matmul %38, %42, %cst_21 {dimension_numbers = #tpu.dot_dimension_numbers<[1], [0], [0], [1], [0, 0, 1, 1], [], []>} : vector<8x32xf32>, vector<32x128xf32>, vector<8x128xf32> -> vector<8x128xf32>
    %44 = arith.addf %41, %43 : vector<8x128xf32>
    %c0_22 = arith.constant 0 : index
    %c0_23 = arith.constant 0 : index
    %45 = vector.load %arg9[%c0_22, %c0_23] : memref<1x128xf32, #tpu.memory_space<vmem>>, vector<1x128xf32>
    %46 = vector.broadcast %45 : vector<1x128xf32> to vector<8x128xf32>
    %47 = arith.addf %44, %46 : vector<8x128xf32>
    %48 = arith.negf %47 : vector<8x128xf32>
    %49 = math.exp %48 : vector<8x128xf32>
    %cst_24 = arith.constant 1.000000e+00 : f32
    %50 = vector.broadcast %cst_24 : f32 to vector<8x128xf32>
    %51 = arith.addf %50, %49 : vector<8x128xf32>
    %52 = arith.divf %50, %51 : vector<8x128xf32>
    %53 = math.tanh %47 : vector<8x128xf32>
    %54 = vector.extract_strided_slice %52 {offsets = [0, 0], sizes = [8, 32], strides = [1, 1]} : vector<8x128xf32> to vector<8x32xf32>
    %55 = vector.extract_strided_slice %52 {offsets = [0, 32], sizes = [8, 32], strides = [1, 1]} : vector<8x128xf32> to vector<8x32xf32>
    %56 = vector.extract_strided_slice %53 {offsets = [0, 64], sizes = [8, 32], strides = [1, 1]} : vector<8x128xf32> to vector<8x32xf32>
    %57 = vector.extract_strided_slice %52 {offsets = [0, 96], sizes = [8, 32], strides = [1, 1]} : vector<8x128xf32> to vector<8x32xf32>
    %58 = arith.mulf %55, %39 : vector<8x32xf32>
    %59 = arith.mulf %54, %56 : vector<8x32xf32>
    %60 = arith.addf %58, %59 : vector<8x32xf32>
    %61 = math.tanh %60 : vector<8x32xf32>
    %62 = arith.mulf %57, %61 : vector<8x32xf32>
    %63 = tpu.concatenate %37, %35, %62, %60 in 1 : vector<8x32xf32>, vector<8x32xf32>, vector<8x32xf32>, vector<8x32xf32> -> vector<8x128xf32>
    %c0_25 = arith.constant 0 : index
    %c0_26 = arith.constant 0 : index
    %64 = vector.load %arg13[%c0_25, %c0_26] : memref<8x128xf32, #tpu.memory_space<vmem>>, vector<8x128xf32>
    tpu.vector_store %arg13[%c0_25, %c0_26], %63 {strides = array<i32>} : memref<8x128xf32, #tpu.memory_space<vmem>>, vector<8x128xf32>,
    %c0_27 = arith.constant 0 : index
    %c0_28 = arith.constant 0 : index
    %65 = vector.load %arg10[%c0_27, %c0_28] : memref<32x128xf32, #tpu.memory_space<vmem>>, vector<32x128xf32>
    %cst_29 = arith.constant dense<0.000000e+00> : vector<8x128xf32>
    %66 = tpu.matmul %62, %65, %cst_29 {dimension_numbers = #tpu.dot_dimension_numbers<[1], [0], [0], [1], [0, 0, 1, 1], [], []>} : vector<8x32xf32>, vector<32x128xf32>, vector<8x128xf32> -> vector<8x128xf32>
    %c0_30 = arith.constant 0 : index
    %c0_31 = arith.constant 0 : index
    %67 = vector.load %arg11[%c0_30, %c0_31] : memref<1x128xf32, #tpu.memory_space<vmem>>, vector<1x128xf32>
    %68 = vector.broadcast %67 : vector<1x128xf32> to vector<8x128xf32>
    %69 = arith.addf %66, %68 : vector<8x128xf32>
    %c0_32 = arith.constant 0 : index
    %c0_33 = arith.constant 0 : index
    %c0_34 = arith.constant 0 : index
    %70 = vector.load %arg12[%c0_32, %c0_33, %c0_34] : memref<1x8x128xf32, #tpu.memory_space<vmem>>, vector<1x8x128xf32>
    %71 = vector.shape_cast %70 : vector<1x8x128xf32> to vector<8x128xf32>
    %72 = vector.shape_cast %69 : vector<8x128xf32> to vector<1x8x128xf32>
    tpu.vector_store %arg12[%c0_32, %c0_33, %c0_34], %72 {strides = array<i32>} : memref<1x8x128xf32, #tpu.memory_space<vmem>>, vector<1x8x128xf32>,
    return
  }
  func.func @transform_0(%arg0: i32) -> (i32, i32, i32) {
    %c0_i32 = arith.constant 0 : i32
    %c0_i32_0 = arith.constant 0 : i32
    %c0_i32_1 = arith.constant 0 : i32
    return %arg0, %c0_i32, %c0_i32_0 : i32, i32, i32
  }
  func.func @transform_1(%arg0: i32) -> (i32, i32) {
    %c0_i32 = arith.constant 0 : i32
    %c0_i32_0 = arith.constant 0 : i32
    %c0_i32_1 = arith.constant 0 : i32
    return %c0_i32, %c0_i32_0 : i32, i32
  }
  func.func @transform_2(%arg0: i32) -> (i32, i32) {
    %c0_i32 = arith.constant 0 : i32
    %c0_i32_0 = arith.constant 0 : i32
    %c0_i32_1 = arith.constant 0 : i32
    return %c0_i32, %c0_i32_0 : i32, i32
  }
  func.func @transform_3(%arg0: i32) -> (i32, i32) {
    %c0_i32 = arith.constant 0 : i32
    %c0_i32_0 = arith.constant 0 : i32
    %c0_i32_1 = arith.constant 0 : i32
    return %c0_i32, %c0_i32_0 : i32, i32
  }
  func.func @transform_4(%arg0: i32) -> (i32, i32) {
    %c0_i32 = arith.constant 0 : i32
    %c0_i32_0 = arith.constant 0 : i32
    %c0_i32_1 = arith.constant 0 : i32
    return %c0_i32, %c0_i32_0 : i32, i32
  }
  func.func @transform_5(%arg0: i32) -> (i32, i32) {
    %c0_i32 = arith.constant 0 : i32
    %c0_i32_0 = arith.constant 0 : i32
    %c0_i32_1 = arith.constant 0 : i32
    return %c0_i32, %c0_i32_0 : i32, i32
  }
  func.func @transform_6(%arg0: i32) -> (i32, i32) {
    %c0_i32 = arith.constant 0 : i32
    %c0_i32_0 = arith.constant 0 : i32
    %c0_i32_1 = arith.constant 0 : i32
    return %c0_i32, %c0_i32_0 : i32, i32
  }
  func.func @transform_7(%arg0: i32) -> (i32, i32) {
    %c0_i32 = arith.constant 0 : i32
    %c0_i32_0 = arith.constant 0 : i32
    %c0_i32_1 = arith.constant 0 : i32
    return %c0_i32, %c0_i32_0 : i32, i32
  }
  func.func @transform_8(%arg0: i32) -> (i32, i32) {
    %c0_i32 = arith.constant 0 : i32
    %c0_i32_0 = arith.constant 0 : i32
    %c0_i32_1 = arith.constant 0 : i32
    return %c0_i32, %c0_i32_0 : i32, i32
  }
  func.func @transform_9(%arg0: i32) -> (i32, i32) {
    %c0_i32 = arith.constant 0 : i32
    %c0_i32_0 = arith.constant 0 : i32
    %c0_i32_1 = arith.constant 0 : i32
    return %c0_i32, %c0_i32_0 : i32, i32
  }
  func.func @transform_10(%arg0: i32) -> (i32, i32) {
    %c0_i32 = arith.constant 0 : i32
    %c0_i32_0 = arith.constant 0 : i32
    %c0_i32_1 = arith.constant 0 : i32
    return %c0_i32, %c0_i32_0 : i32, i32
  }
  func.func @transform_11(%arg0: i32) -> (i32, i32, i32) {
    %c0_i32 = arith.constant 0 : i32
    %c0_i32_0 = arith.constant 0 : i32
    %c0_i32_1 = arith.constant 0 : i32
    return %arg0, %c0_i32, %c0_i32_0 : i32, i32, i32
  }
  func.func @transform_12(%arg0: i32) -> (i32, i32) {
    %c0_i32 = arith.constant 0 : i32
    %c0_i32_0 = arith.constant 0 : i32
    %c0_i32_1 = arith.constant 0 : i32
    return %c0_i32, %c0_i32_0 : i32, i32
  }
}

</mosaic_0001>

<bundles_post_ra>
// kernel: decoder_forward_seq.1
= control target key start
LH: loop header
LB: loop body
LE: loop exit
PB: predicated region body
PF: predicated region fallthrough
CT: control target
= control target key end

     0   :  { %v851_v0 = vmov 0   ;;  %v852_v2 = vmov 0.0|0.0   ;;  %vm853_vm0 = vmmov 0   ;;  %v854_v8 = vmov 0.0   ;;  %s856_s13 = smov 64   ;;  %s858_s15 = smov 96   ;;  %s1108_s0 = inlined_call_operand.vmem [shape: s32[1,8,1], index: 0, kind: input, shape index: {}]   ;;  %s1109_s1 = inlined_call_operand.vmem [shape: f32[128,32], index: 1, kind: input, shape index: {}]   ;;  %s1110_s4 = inlined_call_operand.vmem [shape: f32[32,128], index: 4, kind: input, shape index: {}]   ;;  %s1111_s3 = inlined_call_operand.vmem [shape: f32[32,128], index: 3, kind: input, shape index: {}]   ;;  %s1112_s2 = inlined_call_operand.vmem [shape: f32[8,128], index: 2, kind: input, shape index: {}, may-alias: {2,12}]   ;;  %s1113_s5 = inlined_call_operand.vmem [shape: f32[1,128], index: 5, kind: input, shape index: {}]   ;;  %s1114_s7 = inlined_call_operand.vmem [shape: f32[32,128], index: 7, kind: input, shape index: {}]   ;;  %s1115_s6 = inlined_call_operand.vmem [shape: f32[32,128], index: 6, kind: input, shape index: {}]   ;;  %s1116_s8 = inlined_call_operand.vmem [shape: f32[1,128], index: 8, kind: input, shape index: {}]   ;;  %s1117_s9 = inlined_call_operand.vmem [shape: f32[32,128], index: 9, kind: input, shape index: {}]   ;;  %s1118_s12 = inlined_call_operand.vmem [shape: f32[8,128], index: 12, kind: output, shape index: {1}, may-alias: {2,12}]   ;;  %s1119_s10 = inlined_call_operand.vmem [shape: f32[1,128], index: 10, kind: input, shape index: {}]   ;;  %s1120_s11 = inlined_call_operand.vmem [shape: f32[1,8,128], index: 11, kind: output, shape index: {0}]  }
   0x1   :  { %834 = vset.pattern.permute.xlu0 %v851_v0  ;;  %v49_v1 = vld [vmem:[%s1108_s0] sm:$0xff]  ;;  %772 = vmatprep.subr.bf16.mxu0 %v852_v2  ;;  %v57_v4 = vld [vmem:[%s1109_s1 + $0x8] sm:$0xff]  ;;  %v58_v6 = vld [vmem:[%s1109_s1 + $0x10] sm:$0xff]  ;;  %vm150_vm1 = vcmask 261120   ;;  %v47_v41 = vlaneseq  ;;  %v855_v44 = vmov 1.0   ;;  %vm529_vm3 = vcmask 523264  }
   0x2   :  { %v56_v3 = vld [vmem:[%s1109_s1] sm:$0xff]  ;;  %51 = vperm.xlu0 %834, %v49_v1   ;;  %v59_v7 = vld [vmem:[%s1109_s1 + $0x18] sm:$0xff]  ;;  %714 = vmatprep.mubr.msk.f32.mxu0 %vm853_vm0, %v854_v8  ;;  %v61_v11 = vld [vmem:[%s1109_s1 + $0x28] sm:$0xff]  ;;  %vm531_vm4 = vcmask 785408  }
   0x3   :  { %v773_v5 = vpack.c.bf16 %v57_v4, %v56_v3  ;;  %796 = vmatprep.subr.bf16.mxu1 %v852_v2  ;;  %725 = vmatprep.mubr.msk.f32.mxu1 %vm853_vm0, %v854_v8  ;;  %v776_v9 = vpack.c.bf16 %v59_v7, %v58_v6  ;;  %v60_v10 = vld [vmem:[%s1109_s1 + $0x20] sm:$0xff]  ;;  %v147_v13 = vld [vmem:[%s1110_s4 + $0x8] sm:$0xff]  ;;  %v148_v14 = vld [vmem:[%s1110_s4 + $0x10] sm:$0xff]  ;;  %v48_v42 = vand.u32 127, %v47_v41 }
   0x4   :  { %v146_v12 = vld [vmem:[%s1110_s4] sm:$0xff]  ;;  %v149_v15 = vld [vmem:[%s1110_s4 + $0x18] sm:$0xff]  ;;  %v779_v16 = vpack.c.bf16 %v61_v11, %v60_v10  ;;  %v62_v18 = vld [vmem:[%s1109_s1 + $0x30] sm:$0xff] }
   0x5   :  { %774 = vmatpush3.bf16.msra.mxu0 %v773_v5  ;;  %v797_v17 = vpack.c.bf16 %v147_v13, %v146_v12  ;;  %v63_v19 = vld [vmem:[%s1109_s1 + $0x38] sm:$0xff]  ;;  %v800_v20 = vpack.c.bf16 %v149_v15, %v148_v14  ;;  %v142_v21 = vld [vmem:[%s1111_s3] sm:$0xff]  ;;  %v143_v22 = vld [vmem:[%s1111_s3 + $0x8] sm:$0xff] }
   0x6   :  { %775 = vmatprep.subr.bf16.mxu0 %v852_v2  ;;  %v782_v23 = vpack.c.bf16 %v63_v19, %v62_v18  ;;  %v64_v24 = vld [vmem:[%s1109_s1 + $0x40] sm:$0xff]  ;;  %v65_v25 = vld [vmem:[%s1109_s1 + $0x48] sm:$0xff]  ;;  %v803_v27 = vpack.c.bf16 %v143_v22, %v142_v21  ;;  %v144_v28 = vld [vmem:[%s1111_s3 + $0x10] sm:$0xff] }
   0x7   :  { %798 = vmatpush3.bf16.msra.mxu1 %v797_v17  ;;  %v988_v26 = vld [vmem:[%s1112_s2] sm:$0xff]  ;;  %v145_v29 = vld [vmem:[%s1111_s3 + $0x18] sm:$0xff]  ;;  %v785_v30 = vpack.c.bf16 %v65_v25, %v64_v24  ;;  %v66_v31 = vld [vmem:[%s1109_s1 + $0x50] sm:$0xff] }
   0x8   :  { %799 = vmatprep.subr.bf16.mxu1 %v852_v2  ;;  %v67_v32 = vld [vmem:[%s1109_s1 + $0x58] sm:$0xff]  ;;  %v806_v33 = vpack.c.bf16 %v145_v29, %v144_v28  ;;  %v68_v35 = vld [vmem:[%s1109_s1 + $0x60] sm:$0xff]  ;;  %v69_v36 = vld [vmem:[%s1109_s1 + $0x68] sm:$0xff] }
   0x9   :  { %777 = vmatpush3.bf16.msra.mxu0 %v776_v9  ;;  %v788_v34 = vpack.c.bf16 %v67_v32, %v66_v31  ;;  %v791_v37 = vpack.c.bf16 %v69_v36, %v68_v35  ;;  %v70_v38 = vld [vmem:[%s1109_s1 + $0x70] sm:$0xff]  ;;  %v71_v39 = vld [vmem:[%s1109_s1 + $0x78] sm:$0xff]  ;;  %v632_v50 = vld [vmem:[%s1113_s5] ss:$0 sm:$0xff]  ;;  %s857_s5 = smov 32  }
   0xa   :  { %778 = vmatprep.subr.bf16.mxu0 %v852_v2  ;;  %v794_v40 = vpack.c.bf16 %v71_v39, %v70_v38  ;;  %v333_v0 = vld [vmem:[%s1114_s7] sm:$0xff]  ;;  %v334_v1 = vld [vmem:[%s1114_s7 + $0x8] sm:$0xff]  ;;  %v335_v3 = vld [vmem:[%s1114_s7 + $0x10] sm:$0xff] }
   0xb   :  { %801 = vmatpush3.bf16.msra.mxu1 %v800_v20  ;;  %v809_v4 = vpack.c.bf16 %v334_v1, %v333_v0  ;;  %v336_v5 = vld [vmem:[%s1114_s7 + $0x18] sm:$0xff]  ;;  %v329_v7 = vld [vmem:[%s1115_s6] sm:$0xff]  ;;  %v330_v9 = vld [vmem:[%s1115_s6 + $0x8] sm:$0xff] }
   0xc   :  { %802 = vmatprep.subr.bf16.mxu1 %v852_v2  ;;  %v812_v6 = vpack.c.bf16 %v336_v5, %v335_v3  ;;  %v815_v11 = vpack.c.bf16 %v330_v9, %v329_v7  ;;  %v331_v12 = vld [vmem:[%s1115_s6 + $0x10] sm:$0xff]  ;;  %v332_v13 = vld [vmem:[%s1115_s6 + $0x18] sm:$0xff]  ;;  %v636_v22 = vld [vmem:[%s1116_s8] ss:$0 sm:$0xff] }
   0xd   :  { %780 = vmatpush3.bf16.msra.mxu0 %v779_v16  ;;  %v818_v15 = vpack.c.bf16 %v332_v13, %v331_v12  ;;  %v534_v35 = vld [vmem:[%s1117_s9] sm:$0xff]  ;;  %v535_v36 = vld [vmem:[%s1117_s9 + $0x8] sm:$0xff]  ;;  %v537_v39 = vld [vmem:[%s1117_s9 + $0x18] sm:$0xff] }
   0xe   :  { %781 = vmatprep.subr.bf16.mxu0 %v852_v2  ;;  %726 = vmatmul.mubr.msk.f32.vlgmr.msra.gmra.mrb[0].mxu1 %vm150_vm1, %v988_v26  ;;  %v821_v38 = vpack.c.bf16 %v535_v36, %v534_v35 }
   0xf   :  { %804 = vmatpush3.bf16.msra.mxu1 %v803_v27  ;;  %736 = vmatprep.mubr.msk.f32.mxu1 %vm853_vm0, %v854_v8 }
  0x10   :  { %805 = vmatprep.subr.bf16.mxu1 %v852_v2 }
  0x11   :  { %783 = vmatpush3.bf16.msra.mxu0 %v782_v23 }
  0x12   :  { %784 = vmatprep.subr.bf16.mxu0 %v852_v2 }
  0x13   :  { %807 = vmatpush3.bf16.msra.mxu1 %v806_v33 }
  0x14   :  { %808 = vmatprep.subr.bf16.mxu1 %v852_v2 }
  0x15   :  { %786 = vmatpush3.bf16.msra.mxu0 %v785_v30 }
  0x16   :  { %787 = vmatprep.subr.bf16.mxu0 %v852_v2 }
  0x19   :  { %789 = vmatpush3.bf16.msra.mxu0 %v788_v34 }
  0x1a   :  { %790 = vmatprep.subr.bf16.mxu0 %v852_v2 }
  0x1d   :  { %792 = vmatpush3.bf16.msra.mxu0 %v791_v37  ;;  %v536_v37 = vld [vmem:[%s1117_s9 + $0x10] sm:$0xff] }
  0x1e   :  { %793 = vmatprep.subr.bf16.mxu0 %v852_v2 }
  0x21   :  { %795 = vmatpush3.bf16.msra.mxu0 %v794_v40  ;;  %v824_v40 = vpack.c.bf16 %v537_v39, %v536_v37 }
  0x22   :  { %820 = vmatprep.subr.bf16.mxu0 %v852_v2 }
  0x81   :  { %v52_v43 = vpop.permute.xlu0 %51 }
  0x82   :  { %vm53_vm2 = vcmp.eq.s32.totalorder %v48_v42, %v52_v43 }
  0x83   :  { %715 = vmatmul.mubr.msk.f32.vlgmr.msra.gmra.mrb[0].mxu0 %vm53_vm2, %v855_v44 }
  0x84   :  { %769 = vmatprep.mubr.msk.f32.mxu0 %vm853_vm0, %v854_v8  ;;  %822 = vmatpush3.bf16.msra.mxu0 %v821_v38 }
  0x85   :  { %823 = vmatprep.subr.bf16.mxu0 %v852_v2 }
  0x88   :  { %825 = vmatpush3.bf16.msra.mxu0 %v824_v40 }
  0xe1   :  { %v220_v45 = vpop.f32.mrb[0].mxu1 }
  0xe2   :  { %v727_v46 = vpop.f32.mrb[1].mxu1 }
 0x156   :  { %v138_v47 = vpop.f32.mrb[0].mxu0 }
 0x157   :  { %v716_v48 = vpop.f32.mrb[1].mxu0  ;;  %737 = vmatmul.mubr.msk.f32.vlgmr.msra.gmra.mrb[2].mxu1 %vm150_vm1, %v138_v47 }
 0x158   :  { %747 = vmatprep.mubr.msk.f32.mxu1 %vm853_vm0, %v854_v8  ;;  %810 = vmatpush3.bf16.msra.mxu1 %v809_v4 }
 0x159   :  { %811 = vmatprep.subr.bf16.mxu1 %v852_v2 }
 0x15c   :  { %813 = vmatpush3.bf16.msra.mxu1 %v812_v6 }
 0x15d   :  { %814 = vmatprep.subr.bf16.mxu1 %v852_v2 }
 0x22a   :  { %v293_v49 = vpop.f32.mrb[2].mxu1 }
 0x22b   :  { %v294_v51 = vadd.f32 %v293_v49, %v220_v45  ;;  %v738_v52 = vpop.f32.mrb[3].mxu1  ;;  %v638_v49 = vld [vmem:[%s1119_s10] ss:$0 sm:$0xff] }
 0x22d   :  { %v304_v53 = vadd.f32 %v632_v50, %v294_v51 }
 0x22f   :  { %835 = vtanh.f32 %v304_v53  ;;  %v633_v55 = vmul.f32 -1.442695, %v304_v53 }
 0x231   :  { %837 = vpow2.f32 %v633_v55 }
 0x239   :  { %v836_v54 = vpop.eup %835 }
 0x23a   :  { %314 = vrot.lane.b32.xlu0 %v836_v54, %s856_s13 }
 0x23b   :  { %v838_v56 = vpop.eup %837 }
 0x23c   :  { %v308_v57 = vadd.f32 1.0, %v838_v56 }
 0x23e   :  { %337 = vrot.lane.b32.xlu0 %v988_v26, %s856_s13  ;;  %839 = vrcp.f32 %v308_v57 }
 0x248   :  { %v840_v58 = vpop.eup %839 }
 0x249   :  { %v312_v61 = vmul.f32 %v840_v58, %v988_v26 }
 0x2ac   :  { %v315_v59 = vpop.permute.xlu0 %314 }
 0x2ad   :  { %v317_v60 = vmul.f32 %v840_v58, %v315_v59 }
 0x2af   :  { %319 = vrot.lane.b32.xlu1 %v317_v60, %s857_s5 }
 0x2b0   :  { %v338_v10 = vpop.permute.xlu0 %337 }
 0x2b1   :  { %748 = vmatmul.mubr.msk.f32.vlgmr.msra.gmra.mrb[4].mxu1 %vm150_vm1, %v338_v10 }
 0x2b2   :  { %816 = vmatpush3.bf16.msra.mxu1 %v815_v11  ;;  %758 = vmatprep.mubr.msk.f32.mxu1 %vm853_vm0, %v854_v8 }
 0x2b3   :  { %817 = vmatprep.subr.bf16.mxu1 %v852_v2 }
 0x2b6   :  { %819 = vmatpush3.bf16.msra.mxu1 %v818_v15 }
 0x321   :  { %v320_v62 = vpop.permute.xlu1 %319 }
 0x322   :  { %v1039_v63 = vadd.f32 %v320_v62, %v312_v61 }
 0x324   :  { %841 = vtanh.f32 %v1039_v63 }
 0x32e   :  { %v842_v14 = vpop.eup %841 }
 0x32f   :  { %325 = vrot.lane.b32.xlu1 %v842_v14, %s856_s13 }
 0x384   :  { %v407_v18 = vpop.f32.mrb[4].mxu1 }
 0x385   :  { %v749_v19 = vpop.f32.mrb[5].mxu1 }
 0x3a1   :  { %v326_v16 = vpop.permute.xlu1 %325 }
 0x3a2   :  { %v328_v17 = vmul.f32 %v840_v58, %v326_v16 }
 0x3a4   :  { %412 = vrot.lane.b32.xlu1 %v328_v17, %s857_s5 }
 0x416   :  { %v413_v20 = vpop.permute.xlu1 %412 }
 0x417   :  { %759 = vmatmul.mubr.msk.f32.vlgmr.msra.gmra.mrb[6].mxu1 %vm150_vm1, %v413_v20  ;;  %v528_v2 = vsel %vm150_vm1, %v413_v20, %v1039_v63 }
 0x4ea   :  { %v482_v21 = vpop.f32.mrb[6].mxu1 }
 0x4eb   :  { %v483_v23 = vadd.f32 %v482_v21, %v407_v18  ;;  %v760_v24 = vpop.f32.mrb[7].mxu1 }
 0x4ed   :  { %v493_v8 = vadd.f32 %v636_v22, %v483_v23 }
 0x4ef   :  { %843 = vtanh.f32 %v493_v8  ;;  %v637_v26 = vmul.f32 -1.442695, %v493_v8 }
 0x4f1   :  { %845 = vpow2.f32 %v637_v26 }
 0x4f9   :  { %v844_v25 = vpop.eup %843 }
 0x4fa   :  { %504 = vrot.lane.b32.xlu0 %v844_v25, %s856_s13 }
 0x4fb   :  { %v846_v27 = vpop.eup %845 }
 0x4fc   :  { %v497_v28 = vadd.f32 1.0, %v846_v27 }
 0x4fe   :  { %847 = vrcp.f32 %v497_v28 }
 0x508   :  { %v848_v29 = vpop.eup %847 }
 0x509   :  { %v502_v32 = vmul.f32 %v848_v29, %v338_v10 }
 0x56c   :  { %v505_v30 = vpop.permute.xlu0 %504 }
 0x56d   :  { %v507_v31 = vmul.f32 %v848_v29, %v505_v30 }
 0x56f   :  { %509 = vrot.lane.b32.xlu1 %v507_v31, %s857_s5 }
 0x5e1   :  { %v510_v33 = vpop.permute.xlu1 %509 }
 0x5e2   :  { %v512_v34 = vadd.f32 %v510_v33, %v502_v32 }
 0x5e4   :  { %849 = vtanh.f32 %v512_v34 }
 0x5ee   :  { %v850_v41 = vpop.eup %849 }
 0x5ef   :  { %515 = vrot.lane.b32.xlu0 %v850_v41, %s856_s13 }
 0x661   :  { %v516_v42 = vpop.permute.xlu0 %515 }
 0x662   :  { %v518_v43 = vmul.f32 %v848_v29, %v516_v42 }
 0x664   :  { %521 = vrot.lane.b32.xlu0 %v518_v43, %s858_s15  ;;  %545 = vrot.lane.b32.xlu1 %v518_v43, %s857_s5 }
 0x668   :  { %525 = vrot.lane.b32.xlu1 %v512_v34, %s856_s13 }
 0x6d6   :  { %v546_v44 = vpop.permute.xlu1 %545  ;;  %v522_v45 = vpop.permute.xlu0 %521 }
 0x6d7   :  { %770 = vmatmul.mubr.msk.f32.vlgmr.msra.gmra.mrb[2].mxu0 %vm150_vm1, %v546_v44  ;;  %v530_v46 = vsel %vm529_vm3, %v528_v2, %v522_v45 }
 0x6da   :  { %v526_v47 = vpop.permute.xlu1 %525 }
 0x6db   :  { %v532_v48 = vsel %vm531_vm4, %v530_v46, %v526_v47 }
 0x6dc   :  { %533 = vst [vmem:[%s1118_s12] sm:$0xff] %v532_v48 }
 0x7aa   :  { %v615_v50 = vpop.f32.mrb[2].mxu0 }
 0x7ab   :  { %v616_v51 = vadd.f32 %v638_v49, %v615_v50  ;;  %v771_v52 = vpop.f32.mrb[3].mxu0 }
 0x7ad   :  { %619 = vst [vmem:[%s1120_s11] sm:$0xff] %v616_v51 }

</bundles_post_ra>
